<compile_context>
chip_gen: v7x
topology: tpu7x:2x2x1
jax: 0.10.0
libtpu: 0.0.40
codegen_flags: <defaults>
</compile_context>

<pallas_src>
import jax
import jax.numpy as jnp
from jax.experimental import pallas as pl
from jax.experimental.pallas import tpu as pltpu


def _vi_aff_kernel(x_ref, w_ref, b_ref, o_ref):
    """One block of Pb independent affine maps.

    x_ref: (Pb, S, I)   w_ref: (Pb, O, I)   b_ref: (Pb, 1, O)   o_ref: (Pb, S, O)
    """
    acc = jax.lax.dot_general(
        x_ref[...], w_ref[...],
        dimension_numbers=(((2,), (2,)), ((0,), (0,))),   # contract i, batch p
        preferred_element_type=jnp.float32,
    )                                                     # (Pb, S, O) f32 on MXU
    o_ref[...] = (acc + b_ref[...].astype(jnp.float32)).astype(o_ref.dtype)


def _pick_p_block(p, s, i, o, itemsize, budget_bytes=8 * 1024 * 1024):
    """Largest divisor of p whose double-buffered block footprint fits the VMEM
    budget; capped so the grid has >=2 steps when p allows (v7x megacore)."""
    per_p = (s * i + o * i + o + s * o) * itemsize * 2    # in+out, double-buffered
    pb = max(1, min(p, budget_bytes // max(per_p, 1)))
    if p >= 2:
        pb = min(pb, max(1, p // 2))                      # keep >=2 grid steps
    while p % pb:                                         # exact tiling, no masking
        pb -= 1
    return pb


def vi_aff(x, w, b, shape):
    """Pallas forward of vi_aff.

    x: (S, P, I); w: anything with leading dim P reshapeable to (P, O, I)
    (e.g. (P, O*I), exactly like the PyTorch module); b: broadcastable to
    (P, O); shape = (I, O) matching self.shape in the module.
    Returns (S, P, O) = einsum('spi,poi->spo', x, w.reshape(P,O,I)) + b.
    """
    i_dim, o_dim = int(shape[0]), int(shape[1])
    s, p, i = x.shape
    assert i == i_dim, (i, i_dim)

    w3 = jnp.reshape(w, (w.shape[0], o_dim, i_dim))              # (P, O, I)
    assert w3.shape[0] == p, (w3.shape, p)
    b3 = jnp.broadcast_to(b, (p, o_dim)).reshape(p, 1, o_dim)    # (P, 1, O)
    xt = jnp.transpose(x, (1, 0, 2))                             # (P, S, I)

    pb = _pick_p_block(p, s, i_dim, o_dim, x.dtype.itemsize)
    grid = (p // pb,)

    out_t = pl.pallas_call(
        _vi_aff_kernel,
        out_shape=jax.ShapeDtypeStruct((p, s, o_dim), x.dtype),
        grid=grid,
        in_specs=[
            pl.BlockSpec((pb, s, i_dim), lambda g: (g, 0, 0)),
            pl.BlockSpec((pb, o_dim, i_dim), lambda g: (g, 0, 0)),
            pl.BlockSpec((pb, 1, o_dim), lambda g: (g, 0, 0)),
        ],
        out_specs=pl.BlockSpec((pb, s, o_dim), lambda g: (g, 0, 0)),
        compiler_params=pltpu.CompilerParams(
            dimension_semantics=("parallel",)),
    )(xt, w3, b3)

    return jnp.transpose(out_t, (1, 0, 2))                       # (S, P, O)


if __name__ == "__main__":
    key = jax.random.PRNGKey(0)
    S, P, I, O = 8, 4, 32, 16          # seq=8, p-samples=4, hidden in=32 out=16
    shape = (I, O)

    kx, kw, kb = jax.random.split(key, 3)
    x = jax.random.normal(kx, (S, P, I), dtype=jnp.float32)
    w = jax.random.normal(kw, (P, O * I), dtype=jnp.float32)     # flat, as in the module
    b = jax.random.normal(kb, (P, O), dtype=jnp.float32)

    out = vi_aff(x, w, b, shape)
    out = jax.block_until_ready(out)

    # Pure-JAX reference mirroring the PyTorch forward exactly.
    w3 = w.reshape(P, O, I)
    ref = jnp.einsum('spi,poi->spo', x, w3,
                     precision=jax.lax.Precision.HIGHEST) + b

    assert out.shape == ref.shape, (out.shape, ref.shape)
    assert jnp.allclose(out, ref, rtol=2e-2, atol=2e-2), "mismatch vs reference"
    print("KERNEL_OK")
</pallas_src>

<mosaic_0001>
module attributes {stable_mosaic.version = 11 : i64} {
  func.func @_vi_aff_kernel(%arg0: i32, %arg1: memref<2x8x32xf32, #tpu.memory_space<vmem>>, %arg2: memref<2x16x32xf32, #tpu.memory_space<vmem>>, %arg3: memref<2x1x16xf32, #tpu.memory_space<vmem>>, %arg4: memref<2x8x16xf32, #tpu.memory_space<vmem>>) attributes {dimension_semantics = [#tpu.dimension_semantics<parallel>], iteration_bounds = array<i64: 2>, scalar_prefetch = 0 : i64, scratch_operands = 0 : i64, tpu.core_type = #tpu.core_type<tc>, window_params = [{transform_indices = @transform_0, window_bounds = array<i64: 2, 8, 32>}, {transform_indices = @transform_1, window_bounds = array<i64: 2, 16, 32>}, {transform_indices = @transform_2, window_bounds = array<i64: 2, 1, 16>}, {transform_indices = @transform_3, window_bounds = array<i64: 2, 8, 16>}]} {
    %c0 = arith.constant 0 : index
    %c0_0 = arith.constant 0 : index
    %c0_1 = arith.constant 0 : index
    %0 = vector.load %arg1[%c0, %c0_0, %c0_1] : memref<2x8x32xf32, #tpu.memory_space<vmem>>, vector<2x8x32xf32>
    %c0_2 = arith.constant 0 : index
    %c0_3 = arith.constant 0 : index
    %c0_4 = arith.constant 0 : index
    %1 = vector.load %arg2[%c0_2, %c0_3, %c0_4] : memref<2x16x32xf32, #tpu.memory_space<vmem>>, vector<2x16x32xf32>
    %cst = arith.constant dense<0.000000e+00> : vector<2x8x16xf32>
    %2 = tpu.matmul %0, %1, %cst {dimension_numbers = #tpu.dot_dimension_numbers<[2], [2], [1], [1], [0, 0, 0, 1, 1, 1], [0], [0]>} : vector<2x8x32xf32>, vector<2x16x32xf32>, vector<2x8x16xf32> -> vector<2x8x16xf32>
    %c0_5 = arith.constant 0 : index
    %c0_6 = arith.constant 0 : index
    %c0_7 = arith.constant 0 : index
    %3 = vector.load %arg3[%c0_5, %c0_6, %c0_7] : memref<2x1x16xf32, #tpu.memory_space<vmem>>, vector<2x1x16xf32>
    %4 = vector.broadcast %3 : vector<2x1x16xf32> to vector<2x8x16xf32>
    %5 = arith.addf %2, %4 : vector<2x8x16xf32>
    %c0_8 = arith.constant 0 : index
    %c0_9 = arith.constant 0 : index
    %c0_10 = arith.constant 0 : index
    %6 = vector.load %arg4[%c0_8, %c0_9, %c0_10] : memref<2x8x16xf32, #tpu.memory_space<vmem>>, vector<2x8x16xf32>
    tpu.vector_store %arg4[%c0_8, %c0_9, %c0_10], %5 {strides = array<i32>} : memref<2x8x16xf32, #tpu.memory_space<vmem>>, vector<2x8x16xf32>,
    return
  }
  func.func @transform_0(%arg0: i32) -> (i32, i32, i32) {
    %c0_i32 = arith.constant 0 : i32
    %c0_i32_0 = arith.constant 0 : i32
    %c0_i32_1 = arith.constant 0 : i32
    return %arg0, %c0_i32, %c0_i32_0 : i32, i32, i32
  }
  func.func @transform_1(%arg0: i32) -> (i32, i32, i32) {
    %c0_i32 = arith.constant 0 : i32
    %c0_i32_0 = arith.constant 0 : i32
    %c0_i32_1 = arith.constant 0 : i32
    return %arg0, %c0_i32, %c0_i32_0 : i32, i32, i32
  }
  func.func @transform_2(%arg0: i32) -> (i32, i32, i32) {
    %c0_i32 = arith.constant 0 : i32
    %c0_i32_0 = arith.constant 0 : i32
    %c0_i32_1 = arith.constant 0 : i32
    return %arg0, %c0_i32, %c0_i32_0 : i32, i32, i32
  }
  func.func @transform_3(%arg0: i32) -> (i32, i32, i32) {
    %c0_i32 = arith.constant 0 : i32
    %c0_i32_0 = arith.constant 0 : i32
    %c0_i32_1 = arith.constant 0 : i32
    return %arg0, %c0_i32, %c0_i32_0 : i32, i32, i32
  }
}

</mosaic_0001>

<bundles_post_ra>
// kernel: tpu_custom_call.1
= control target key start
LH: loop header
LB: loop body
LE: loop exit
PB: predicated region body
PF: predicated region fallthrough
CT: control target
= control target key end

     0   :  { %8 = vsyncpa [#allocation3], 0  ;;  %s1059_s0 = inlined_call_operand.hbm [shape: f32[4,8,32], index: 0, kind: input, shape index: {}]   ;;  %s1060_s1 = inlined_call_operand.hbm [shape: f32[4,16,32], index: 1, kind: input, shape index: {}]   ;;  %s1061_s2 = inlined_call_operand.vmem [shape: f32[4,1,16], index: 2, kind: input, shape index: {}]   ;;  %s1062_s3 = inlined_call_operand.hbm [shape: f32[4,8,16], index: 3, kind: output, shape index: {}]  }
   0x1   :  { %10 = vsyncpa [#allocation3 + $0x1], 0 }
   0x2   :  { %11 = vsyncpa [#allocation6], 0 }
   0x3   :  { %13 = vsyncpa [#allocation6 + $0x1], 0 }
   0x4   :  { %14 = vsyncpa [#allocation4], 0 }
   0x5   :  { %16 = vsyncpa [#allocation4 + $0x1], 0  ;;  %s833_s12 = smov 0   ;;  %s835_s13 = smov 0  }
   0x6   :  { %s837_s14 = smov 0   ;;  %s839_s15 = smov 0  }
   0x7 LB: > { %s854_s16 = sadd.s32 4294967295, %s801_s15   ;;  %s553_s17 = sadd.s32 4294967294, %s801_s15   ;;  %s801_s15 = sphi %s839_s15, %s1078_s15   ;;  %s797_s14 = sphi %s837_s14, %s1077_s14   ;;  %s793_s13 = sphi %s835_s13, %s1076_s13   ;;  %s789_s12 = sphi %s833_s12, %s1075_s12  }
   0x8   : > { %s858_s18 = sadd.s32 1, %s801_s15   ;;  %s29_s19 = sadd.s32 1, %s797_s14 }
   0x9   : > { %s26_s20 = ssub.s32 %s801_s15, %s858_s18  ;;  %p36_p0 = scmp.ne.s32.totalorder %s797_s14, %s793_s13 }
   0xa   : > { %p27_p1 = scmp.eq.s32.totalorder %s26_s20, 0  ;;  %p37_p2 = scmp.eq.s32.totalorder %s801_s15, 0 }
   0xb   : > { %p42_p3 = scmp.ne.s32.totalorder %s793_s13, %s789_s12  ;;  %p43_p4 = scmp.eq.s32.totalorder %s854_s16, 0 }
   0xc   : > { %s870_s21 = scalar_select %p27_p1, %s797_s14, %s29_s19  }
   0xd   : > { %p872_p5 = por %p37_p2, %p36_p0  ;;  %p876_p6 = por %p43_p4, %p42_p3 }
   0xe   : > { %p118_p7 = scmp.eq.s32.totalorder %s854_s16, 1  ;;  %p124_p8 = scmp.eq.s32.totalorder %s553_s17, 1 }
   0xf   : > { %s1066_s23 = scalar_select %p876_p6, 1, 0 }
  0x10   : > { %p630_p10 = scmp.lt.s32.totalorder %s801_s15, 2  ;;  %p883_p11 = por %p118_p7, %p36_p0 }
  0x11   : > { %p887_p12 = por %p124_p8, %p42_p3  ;;  %s892_s26 = sand.u32 1, %s797_s14  }
  0x12   : > { %s1067_s24 = scalar_select %p883_p11, 1, 0 }
  0x13   : > { %s1068_s25 = scalar_select %p887_p12, 1, 0 }
  0x14   : > { %s581_s27 = sshll.u32 %s801_s15, 8  ;;  %s556_s28 = sshll.u32 %s892_s26, 4 }
  0x15   : > { %s899_s4 = scalar_lea.hbm %s1059_s0, %s581_s27  ;;  %s148_s5 = scalar_lea.vmem [#allocation2], %s556_s28 }
  0x16   : > { %s155_s6 = sshll.u32 %s148_s5, 4  ;;  %p903_p13 = pnand %p630_p10, %p872_p5  ;;  %s907_s6 = int_to_ptr.vmem [resolvable:$true] %s155_s6 }
  0x17   : > { %s145_s8 = scalar_lea.sflag [#allocation3], %s892_s26  ;;  %s671_s9 = scalar_lea.hbm %s899_s4, 256 }
  0x18   : > { %p672_p0 = scmp.ne.s32.totalorder %s899_s4, %s671_s9  ;;  %p673_p1 = pneg %p903_p13 }
  0x19   : > { %s676_s17 = scalar_lea.hbm %s1059_s0, 512  ;;  %p677_p4 = scmp.lt.u32.totalorder %s899_s4, %s1059_s0 }
  0x1a   : > { %p674_p2 = pnand %p673_p1, %p672_p0  ;;  %p678_p5 = scmp.lt.u32.totalorder %s676_s17, %s671_s9 }
  0x1b   : > { %p680_p8 = scmp.lt.u32.totalorder %s671_s9, %s899_s4 }
  0x1c   : > { %p675_p3 = pneg %p674_p2  ;;  %p679_p7 = por %p678_p5, %p677_p4 }
  0x1e   : > { %p681_p10 = por %p680_p8, %p679_p7 }
  0x20   : > { %p682_p9 = pnand %p681_p10, %p675_p3 }
  0x22   : > { %685 = shalt.err (!%p682_p9)
}
  0x23   : > { %s686_s22 = scalar_lea.vmem %s907_s6, 256  ;;  %s803_s27 = smov [#allocation2]  }
  0x24   : > { %p687_p0 = scmp.ne.s32.totalorder %s907_s6, %s686_s22  ;;  %s691_s28 = sshll.u32 %s803_s27, 4  ;;  %s692_s28 = int_to_ptr.vmem [resolvable:$false] %s691_s28 }
  0x25   : > { %s693_s29 = scalar_lea.vmem %s692_s28, 512  ;;  %p694_p11 = scmp.lt.s32.totalorder %s907_s6, %s692_s28 }
  0x26   : > { %p689_p2 = pnand %p687_p0, %p673_p1  ;;  %p695_p4 = scmp.lt.s32.totalorder %s693_s29, %s686_s22 }
  0x28   : > { %p690_p12 = pneg %p689_p2  ;;  %p696_p5 = por %p695_p4, %p694_p11 }
  0x2a   : > { %p697_p7 = pnand %p696_p5, %p690_p12 }
  0x2c   : > { %700 = shalt.err (!%p697_p7)
}
  0x2d   : > { %s804_s30 = smov 128   ;;  %s805_s5 = smov 8  }
  0x2e   : > { %622 = dma.hbm_to_vmem [thread:$0]  (!%p903_p13), %s899_s4, 256, %s907_s6, %s145_s8, %s804_s30, %s804_s30, %s805_s5  }
  0x2f   : > { %p563_p9 = scmp.ge.s32.totalorder %s801_s15, 1  ;;  %p193_p11 = scmp.lt.s32.totalorder %s801_s15, 3 }
  0x30   : > { %s559_s9 = sshll.u32 %s892_s26, 5  ;;  %s583_s11 = sshll.u32 %s801_s15, 9 }
  0x31   : > { %p943_p12 = pnand %p563_p9, %p193_p11  ;;  %s169_s17 = scalar_lea.vmem [#allocation5], %s559_s9 }
  0x32   : > { %s177_s19 = sshll.u32 %s169_s17, 4  ;;  %s951_s27 = scalar_lea.hbm %s1060_s1, %s583_s11  ;;  %s953_s19 = int_to_ptr.vmem [resolvable:$true] %s177_s19 }
  0x33   : > { %s166_s4 = scalar_lea.sflag [#allocation6], %s892_s26  ;;  %s701_s6 = scalar_lea.hbm %s951_s27, 512 }
  0x34   : > { %p702_p3 = scmp.ne.s32.totalorder %s951_s27, %s701_s6  ;;  %s706_s29 = scalar_lea.hbm %s1060_s1, 1024 }
  0x35   : > { %p707_p0 = scmp.lt.u32.totalorder %s951_s27, %s1060_s1  ;;  %p708_p2 = scmp.lt.u32.totalorder %s706_s29, %s701_s6 }
  0x36   : > { %p704_p8 = pnand %p702_p3, %p673_p1  ;;  %p710_p5 = scmp.lt.u32.totalorder %s701_s6, %s951_s27 }
  0x37   : > { %p709_p4 = por %p708_p2, %p707_p0 }
  0x38   : > { %p705_p10 = pneg %p704_p8 }
  0x39   : > { %p711_p7 = por %p710_p5, %p709_p4 }
  0x3b   : > { %p712_p9 = pnand %p711_p7, %p705_p10 }
  0x3d   : > { %715 = shalt.err (!%p712_p9)
}
  0x3e   : > { %s716_s17 = scalar_lea.vmem %s953_s19, 512  ;;  %s806_s20 = smov [#allocation5]  }
  0x3f   : > { %p717_p11 = scmp.ne.s32.totalorder %s953_s19, %s716_s17  ;;  %s721_s22 = sshll.u32 %s806_s20, 4  ;;  %s722_s22 = int_to_ptr.vmem [resolvable:$false] %s721_s22 }
  0x40   : > { %s723_s8 = scalar_lea.vmem %s722_s22, 1024  ;;  %p724_p6 = scmp.lt.s32.totalorder %s953_s19, %s722_s22 }
  0x41   : > { %p719_p3 = pnand %p717_p11, %p673_p1  ;;  %p725_p0 = scmp.lt.s32.totalorder %s723_s8, %s716_s17 }
  0x43   : > { %p720_p8 = pneg %p719_p3  ;;  %p726_p2 = por %p725_p0, %p724_p6 }
  0x45   : > { %p727_p4 = pnand %p726_p2, %p720_p8 }
  0x47   : > { %730 = shalt.err (!%p727_p4)
}
  0x48   : > { %625 = dma.hbm_to_vmem [thread:$0]  (!%p903_p13), %s951_s27, 512, %s953_s19, %s166_s4, %s804_s30, %s804_s30, %s805_s5  }
  0x49   : > { %197 = sbr.rel (%p943_p12) target bundleno = 325 (0x145), region = 32  ;;  %s987_s6 = sand.u32 (!%p943_p12), 1, %s793_s13  }
  0x4a   : > { %s564_s28 = sshll.u32 (!%p943_p12), %s987_s6, 4  ;;  %s200_s7 = scalar_lea.sflag (!%p943_p12), [#allocation3], %s987_s6 }
  0x4b   : > { %s203_s29 = scalar_lea.vmem (!%p943_p12), [#allocation2], %s564_s28  ;;  %p1071_p6 = scmp.ne.s32.totalorder (!%p943_p12), %s1066_s23, 0 }
  0x50   : > { %776 = dma.done.wait (%p1071_p6), %s200_s7, 256  }
  0x51   : > { %778 = vsyncadd (%p1071_p6), %s200_s7, 4294967040  ;;  %s565_s26 = sshll.u32 %s987_s6, 5  ;;  %s209_s30 = scalar_lea.sflag [#allocation6], %s987_s6 }
  0x52   : > { %s212_s5 = scalar_lea.vmem [#allocation5], %s565_s26 }
  0x53   : > { %780 = dma.done.wait (%p1071_p6), %s209_s30, 512  }
  0x54   : > { %782 = vsyncadd (%p1071_p6), %s209_s30, 4294966784  ;;  %v807_v0 = vmov 0.0|0.0   ;;  %vm808_vm0 = vmmov 0   ;;  %v809_v1 = vmov 0.0   ;;  %vm272_vm1 = vcmask 261120   ;;  %v254_v2 = vld [vmem:[%s212_s5] sm:$0xff] }
  0x55   : > { %605 = vmatprep.subr.bf16.mxu0 %v807_v0  ;;  %609 = vmatprep.subr.bf16.mxu1 %v807_v0  ;;  %vm607_vm2 = vmpackc.low %vm272_vm1, %vm272_vm1  ;;  %v255_v3 = vld [vmem:[%s212_s5 + $0x8] sm:$0xff]  ;;  %v256_v4 = vld [vmem:[%s212_s5 + $0x10] sm:$0xff]  ;;  %s567_s23 = sshll.u32 %s854_s16, 1  ;;  %s243_s4 = scalar_lea.vmem [#allocation7], %s564_s28  ;;  %vm431_vm3 = vcmask 130048  }
  0x56   : > { %595 = vmatprep.mubr.msk.f32.mxu0 %vm808_vm0, %v809_v1  ;;  %602 = vmatprep.mubr.msk.f32.mxu1 %vm808_vm0, %v809_v1  ;;  %v606_v5 = vpack.c.bf16 %v255_v3, %v254_v2  ;;  %v257_v6 = vld [vmem:[%s212_s5 + $0x18] sm:$0xff]  ;;  %v252_v8 = vld [vmem:[%s203_s29] sm:$0xff]  ;;  %p247_p13 = scmp.lt.s32.totalorder %s567_s23, 3  ;;  %s448_s9 = sshll.u32 %s243_s4, 4  ;;  %s1010_s9 = int_to_ptr.vmem [resolvable:$true] %s448_s9 }
  0x57   : > { %v610_v7 = vpack.c.bf16 %v257_v6, %v256_v4  ;;  %v253_v9 = vld [vmem:[%s203_s29 + $0x8] sm:$0xff]  ;;  %s584_s11 = sshll.u32 %s854_s16, 8  ;;  %s435_s16 = scalar_lea.sflag [#allocation4], %s987_s6 }
  0x58   : > { %608 = vmatpush3.bf16.xpose.msk.msra.mxu0 %vm607_vm2, %v606_v5  ;;  %s1080_s23 = smov (!%p247_p13, %s567_s23), 3  ;;  %s1015_s22 = scalar_lea.hbm %s1062_s3, %s584_s11 }
  0x59   : > { %612 = vmatpush3.bf16.xpose.msk.msra.mxu1 %vm607_vm2, %v610_v7  ;;  %s249_s27 = scalar_lea.vmem %s1061_s2, %s1080_s23  ;;  %s731_s8 = scalar_lea.vmem %s1010_s9, 256 }
  0x5a   : > { %v568_v10 = vld [vmem:[%s249_s27] ss:$0 sm:$0xff]  ;;  %v569_v11 = vld [vmem:[%s249_s27 + $0x1] ss:$0 sm:$0xff]  ;;  %p732_p1 = scmp.ne.s32.totalorder %s1010_s9, %s731_s8  ;;  %p1072_p12 = scmp.ne.s32.totalorder %s1067_s24, 0 }
  0x5b   : > { %s810_s28 = smov [#allocation7]  }
  0x5c   : > { %p733_p10 = pnand %p732_p1, %p1072_p12  ;;  %s735_s7 = sshll.u32 %s810_s28, 4  ;;  %s736_s7 = int_to_ptr.vmem [resolvable:$false] %s735_s7 }
  0x5d   : > { %s737_s29 = scalar_lea.vmem %s736_s7, 512  ;;  %p738_p7 = scmp.lt.s32.totalorder %s1010_s9, %s736_s7 }
  0x5e   : > { %p734_p5 = pneg %p733_p10  ;;  %p739_p9 = scmp.lt.s32.totalorder %s737_s29, %s731_s8 }
  0x5f   : > { %596 = vmatmul.mubr.msk.f32.vlgmr.msra.gmra.mrb[0].mxu0 %vm272_vm1, %v252_v8 }
  0x60   : > { %603 = vmatmul.mubr.msk.f32.vlgmr.msra.gmra.mrb[0].mxu1 %vm272_vm1, %v253_v9  ;;  %p740_p11 = por %p739_p9, %p738_p7 }
  0x62   : > { %p741_p3 = pnand %p740_p11, %p734_p5 }
 0x132   : > { %v348_v12 = vpop.f32.mrb[0].mxu0 }
 0x133   : > { %v349_v13 = vadd.f32 %v568_v10, %v348_v12  ;;  %v427_v14 = vpop.f32.mrb[0].mxu1  ;;  %v597_v15 = vpop.f32.mrb[1].mxu0 }
 0x134   : > { %v428_v16 = vadd.f32 %v569_v11, %v427_v14  ;;  %v604_v17 = vpop.f32.mrb[1].mxu1 }
 0x135   : > { %432 = vst.msk [vmem:[%s243_s4] sm:$0xff] %vm431_vm3, %v349_v13 }
 0x136   : > { %433 = vst.msk [vmem:[%s243_s4 + $0x8] sm:$0xff] %vm431_vm3, %v428_v16 }
 0x137   : > { %744 = shalt.err (!%p741_p3)
}
 0x138   : > { %s745_s26 = scalar_lea.hbm %s1015_s22, 256  ;;  %s749_s23 = scalar_lea.hbm %s1062_s3, 512 }
 0x139   : > { %p746_p8 = scmp.ne.s32.totalorder %s1015_s22, %s745_s26  ;;  %p750_p4 = scmp.lt.u32.totalorder %s1015_s22, %s1062_s3 }
 0x13a   : > { %p751_p6 = scmp.lt.u32.totalorder %s749_s23, %s745_s26  ;;  %p753_p1 = scmp.lt.u32.totalorder %s745_s26, %s1015_s22 }
 0x13b   : > { %p747_p0 = pnand %p746_p8, %p1072_p12 }
 0x13c   : > { %p752_p13 = por %p751_p6, %p750_p4 }
 0x13d   : > { %p748_p2 = pneg %p747_p0 }
 0x13e   : > { %p754_p10 = por %p753_p1, %p752_p13 }
 0x140   : > { %p755_p5 = pnand %p754_p10, %p748_p2 }
 0x142   : > { %758 = shalt.err (!%p755_p5)
}
 0x143   : > { %s811_s27 = smov 128   ;;  %s812_s4 = smov 8  }
 0x144   : > { %617 = dma.vmem_to_hbm [thread:$0]  (%p1072_p12), %s1010_s9, 256, %s1015_s22, %s435_s16, %s811_s27, %s811_s27, %s812_s4  }
 0x145 PF: > { %s463_s11 = sand.u32 1, %s789_s12   ;;  %p1073_p7 = scmp.ne.s32.totalorder %s1068_s25, 0 }
 0x146   : > { %p1074_p9 = scmp.ge.s32.totalorder %s801_s15, 2  ;;  %s464_s17 = scalar_lea.sflag [#allocation4], %s463_s11 }
 0x148   : > { %p627_p11 = pnand %p1074_p9, %p1073_p7 }
 0x14a   : > { %784 = dma.done.wait (!%p627_p11), %s464_s17, 256  }
 0x14b   : > { %786 = vsyncadd (!%p627_p11), %s464_s17, 4294967040  ;;  %p19_p3 = scmp.ge.s32.totalorder %s858_s18, 4   ;;  %s1075_s12 = smov %s793_s13 }
 0x14c   : > { %s1076_s13 = smov %s797_s14  ;;  %s1077_s14 = smov %s870_s21 }
 0x14d   : > { %s1078_s15 = smov %s858_s18  ;;  %21 = sbr.rel (!%p19_p3) target bundleno = 7 (0x7), region = 93 }
 0x154   :  { %469 = vsyncpa [#allocation3], 1 }
 0x155   :  { %471 = vsyncpa [#allocation3 + $0x1], 1 }
 0x156   :  { %472 = vsyncpa [#allocation6], 1 }
 0x157   :  { %474 = vsyncpa [#allocation6 + $0x1], 1 }
 0x158   :  { %475 = vsyncpa [#allocation4], 1 }
 0x159   :  { %477 = vsyncpa [#allocation4 + $0x1], 1 }

</bundles_post_ra>
